<compile_context>
chip_gen: v6e
topology: v6e:2x2x1
jax: 0.10.0
libtpu: 0.0.40
codegen_flags: <defaults>
</compile_context>

<pallas_src>
import functools

import jax
import jax.numpy as jnp
from jax.experimental import pallas as pl
from jax.experimental.pallas import tpu as pltpu

_NEG = -1e30  # finite "minus infinity" used to pad the class (lane) axis


def _round_up(x, m):
    return ((x + m - 1) // m) * m


def _kl_div_kernel(x_ref, y_ref, o_ref, *, inv_temp):
    """Pointwise KL(q || p), p = softmax(x/T), q = softmax(y/T), reduction='none'."""
    x = x_ref[...].astype(jnp.float32) * inv_temp
    y = y_ref[...].astype(jnp.float32) * inv_temp

    # log_softmax(out1 / T) along the class (last / lane) axis.
    x_max = jnp.max(x, axis=-1, keepdims=True)
    x_shift = x - x_max
    log_zx = jnp.log(jnp.sum(jnp.exp(x_shift), axis=-1, keepdims=True))
    log_p = x_shift - log_zx

    # softmax(out2 / T): derive log_q algebraically (one log per row) and use the
    # EUP approximate reciprocal only to scale q.
    y_max = jnp.max(y, axis=-1, keepdims=True)
    y_shift = y - y_max
    e_y = jnp.exp(y_shift)
    sum_y = jnp.sum(e_y, axis=-1, keepdims=True)
    log_q = y_shift - jnp.log(sum_y)
    q = e_y * pl.reciprocal(sum_y, approx=True)

    # PyTorch kl_div zeroes positions where target <= 0; this also masks the
    # padded lanes (whose q underflows to exactly 0).
    loss = jnp.where(q > 0.0, q * (log_q - log_p), 0.0)
    o_ref[...] = loss.astype(o_ref.dtype)


def distillation_loss(out1, out2, temp, *, tile_n=None, out_dtype=None):
    """Elementwise KL(softmax(out2/T) || exp(log_softmax(out1/T))), no reduction."""
    assert out1.shape == out2.shape and out1.ndim == 2
    n, c = out1.shape
    if out_dtype is None:
        out_dtype = out1.dtype

    c_pad = _round_up(c, 128)  # lane-dense loads/stores (unmasked vst)
    in_bytes = max(jnp.dtype(out1.dtype).itemsize, jnp.dtype(out2.dtype).itemsize)
    out_bytes = jnp.dtype(out_dtype).itemsize

    if tile_n is None:
        # Double-buffered VMEM footprint per grid step: 2 inputs + 1 output, x2 buffers.
        per_row = c_pad * (2 * in_bytes + out_bytes) * 2
        budget = 40 << 20  # comfortable on v5e/v6e (128 MiB) and v7x (64 MiB) VMEM
        tile_n = max(8, min(2048, (budget // per_row) // 8 * 8))
        n8 = _round_up(n, 8)
        if tile_n >= n8 and n8 >= 16:
            # Keep >= 2 grid steps so "parallel" can shard rows across v7x's 2 TCs.
            tile_n = _round_up(-(-n8 // 2), 8)
        tile_n = min(tile_n, _round_up(n, 8))
    # TODO(synk): for vocab-scale C (32k+), add a C-tiled online-softmax variant so
    # VMEM per step stays bounded independent of C.

    n_pad = _round_up(n, tile_n)

    x, y = out1, out2
    if c_pad != c or n_pad != n:
        # One fused pad per input: class lanes get _NEG (softmax-neutral), rows get 0.
        if c_pad != c:
            x = jnp.pad(x, ((0, 0), (0, c_pad - c)), constant_values=_NEG)
            y = jnp.pad(y, ((0, 0), (0, c_pad - c)), constant_values=_NEG)
        if n_pad != n:
            x = jnp.pad(x, ((0, n_pad - n), (0, 0)))
            y = jnp.pad(y, ((0, n_pad - n), (0, 0)))

    vmem_usage = tile_n * c_pad * (2 * in_bytes + out_bytes) * 2
    vmem_limit = int(min(max(vmem_usage * 5 // 4 + (4 << 20), 32 << 20), 56 << 20))

    kernel = functools.partial(_kl_div_kernel, inv_temp=1.0 / float(temp))

    cost = pl.CostEstimate(
        flops=int(10 * n_pad * c_pad),
        transcendentals=int(2 * n_pad * c_pad + 3 * n_pad),
        bytes_accessed=int(n_pad * c_pad * (2 * in_bytes + out_bytes)),
    )

    out = pl.pallas_call(
        kernel,
        out_shape=jax.ShapeDtypeStruct((n_pad, c_pad), out_dtype),
        grid_spec=pltpu.PrefetchScalarGridSpec(
            num_scalar_prefetch=0,
            grid=(n_pad // tile_n,),
            in_specs=[
                pl.BlockSpec((tile_n, c_pad), lambda i: (i, 0)),
                pl.BlockSpec((tile_n, c_pad), lambda i: (i, 0)),
            ],
            out_specs=pl.BlockSpec((tile_n, c_pad), lambda i: (i, 0)),
        ),
        compiler_params=pltpu.CompilerParams(
            dimension_semantics=("parallel",),
            vmem_limit_bytes=vmem_limit,
        ),
        cost_estimate=cost,
    )(x, y)

    return out[:n, :c]


if __name__ == "__main__":
    key = jax.random.PRNGKey(0)
    k1, k2, k3, k4 = jax.random.split(key, 4)

    TEMP = 2.0  # distillation temperature (module __init__ arg)

    # Primary check: f32 logits, C not a multiple of 128 (exercises lane padding).
    N, C = 16, 32
    out1 = jax.random.normal(k1, (N, C), dtype=jnp.float32)  # student logits
    out2 = jax.random.normal(k2, (N, C), dtype=jnp.float32)  # teacher logits
    loss = distillation_loss(out1, out2, TEMP)
    jax.block_until_ready(loss)

    log_p_ref = jax.nn.log_softmax(out1 / TEMP, axis=1)
    q_ref = jax.nn.softmax(out2 / TEMP, axis=1)
    ref = q_ref * (jnp.log(q_ref) - log_p_ref)
    assert loss.shape == (N, C)
    assert not bool(jnp.isnan(loss).any())
    assert bool(jnp.allclose(loss, ref, atol=3e-3, rtol=3e-3))

    # Ragged shapes: N not a multiple of the tile, C not a multiple of 128.
    N2, C2 = 10, 100
    a = jax.random.normal(k3, (N2, C2), dtype=jnp.float32)
    b = jax.random.normal(k4, (N2, C2), dtype=jnp.float32)
    loss2 = distillation_loss(a, b, TEMP)
    jax.block_until_ready(loss2)
    ref2 = jax.nn.softmax(b / TEMP, axis=1) * (
        jnp.log(jax.nn.softmax(b / TEMP, axis=1)) - jax.nn.log_softmax(a / TEMP, axis=1)
    )
    assert loss2.shape == (N2, C2)
    assert not bool(jnp.isnan(loss2).any())
    assert bool(jnp.allclose(loss2, ref2, atol=3e-3, rtol=3e-3))

    # bf16 HBM I/O path (halves memory traffic; math stays f32 in-kernel).
    loss_bf16 = distillation_loss(
        out1.astype(jnp.bfloat16), out2.astype(jnp.bfloat16), TEMP, out_dtype=jnp.float32
    )
    jax.block_until_ready(loss_bf16)
    assert not bool(jnp.isnan(loss_bf16).any())
    assert bool(jnp.allclose(loss_bf16, ref, atol=5e-2, rtol=5e-2))

    print("KERNEL_OK")
</pallas_src>

<mosaic_0001>
module attributes {stable_mosaic.version = 11 : i64} {
  func.func @_kl_div_kernel(%arg0: i32, %arg1: memref<8x128xf32, #tpu.memory_space<vmem>>, %arg2: memref<8x128xf32, #tpu.memory_space<vmem>>, %arg3: memref<8x128xf32, #tpu.memory_space<vmem>>) attributes {dimension_semantics = [#tpu.dimension_semantics<parallel>], iteration_bounds = array<i64: 2>, scalar_prefetch = 0 : i64, scratch_operands = 0 : i64, tpu.core_type = #tpu.core_type<tc>, window_params = [{transform_indices = @transform_0, window_bounds = array<i64: 8, 128>}, {transform_indices = @transform_1, window_bounds = array<i64: 8, 128>}, {transform_indices = @transform_2, window_bounds = array<i64: 8, 128>}]} {
    %c0 = arith.constant 0 : index
    %c0_0 = arith.constant 0 : index
    %0 = vector.load %arg1[%c0, %c0_0] : memref<8x128xf32, #tpu.memory_space<vmem>>, vector<8x128xf32>
    %cst = arith.constant 5.000000e-01 : f32
    %1 = vector.broadcast %cst : f32 to vector<8x128xf32>
    %2 = arith.mulf %0, %1 : vector<8x128xf32>
    %c0_1 = arith.constant 0 : index
    %c0_2 = arith.constant 0 : index
    %3 = vector.load %arg2[%c0_1, %c0_2] : memref<8x128xf32, #tpu.memory_space<vmem>>, vector<8x128xf32>
    %cst_3 = arith.constant 5.000000e-01 : f32
    %4 = vector.broadcast %cst_3 : f32 to vector<8x128xf32>
    %5 = arith.mulf %3, %4 : vector<8x128xf32>
    %cst_4 = arith.constant dense<0xFF800000> : vector<8xf32>
    %6 = vector.multi_reduction <maximumf>, %2, %cst_4 [1] : vector<8x128xf32> to vector<8xf32>
    %7 = vector.shape_cast %6 : vector<8xf32> to vector<8x1xf32>
    %8 = vector.broadcast %7 : vector<8x1xf32> to vector<8x128xf32>
    %9 = arith.subf %2, %8 : vector<8x128xf32>
    %10 = math.exp %9 : vector<8x128xf32>
    %cst_5 = arith.constant dense<0.000000e+00> : vector<8xf32>
    %11 = vector.multi_reduction <add>, %10, %cst_5 [1] : vector<8x128xf32> to vector<8xf32>
    %12 = vector.shape_cast %11 : vector<8xf32> to vector<8x1xf32>
    %13 = math.log %12 : vector<8x1xf32>
    %14 = vector.broadcast %13 : vector<8x1xf32> to vector<8x128xf32>
    %15 = arith.subf %9, %14 : vector<8x128xf32>
    %cst_6 = arith.constant dense<0xFF800000> : vector<8xf32>
    %16 = vector.multi_reduction <maximumf>, %5, %cst_6 [1] : vector<8x128xf32> to vector<8xf32>
    %17 = vector.shape_cast %16 : vector<8xf32> to vector<8x1xf32>
    %18 = vector.broadcast %17 : vector<8x1xf32> to vector<8x128xf32>
    %19 = arith.subf %5, %18 : vector<8x128xf32>
    %20 = math.exp %19 : vector<8x128xf32>
    %cst_7 = arith.constant dense<0.000000e+00> : vector<8xf32>
    %21 = vector.multi_reduction <add>, %20, %cst_7 [1] : vector<8x128xf32> to vector<8xf32>
    %22 = vector.shape_cast %21 : vector<8xf32> to vector<8x1xf32>
    %23 = math.log %22 : vector<8x1xf32>
    %24 = vector.broadcast %23 : vector<8x1xf32> to vector<8x128xf32>
    %25 = arith.subf %19, %24 : vector<8x128xf32>
    %26 = tpu.reciprocal %22 {approx = true} : vector<8x1xf32> -> vector<8x1xf32>
    %27 = vector.broadcast %26 : vector<8x1xf32> to vector<8x128xf32>
    %28 = arith.mulf %20, %27 : vector<8x128xf32>
    %cst_8 = arith.constant 0.000000e+00 : f32
    %29 = vector.broadcast %cst_8 : f32 to vector<8x128xf32>
    %30 = arith.cmpf ogt, %28, %29 : vector<8x128xf32>
    %31 = arith.subf %25, %15 : vector<8x128xf32>
    %32 = arith.mulf %28, %31 : vector<8x128xf32>
    %cst_9 = arith.constant 0.000000e+00 : f32
    %33 = vector.broadcast %cst_9 : f32 to vector<8x128xf32>
    %34 = arith.select %30, %32, %33 : vector<8x128xi1>, vector<8x128xf32>
    %c0_10 = arith.constant 0 : index
    %c0_11 = arith.constant 0 : index
    %35 = vector.load %arg3[%c0_10, %c0_11] : memref<8x128xf32, #tpu.memory_space<vmem>>, vector<8x128xf32>
    tpu.vector_store %arg3[%c0_10, %c0_11], %34 {strides = array<i32>} : memref<8x128xf32, #tpu.memory_space<vmem>>, vector<8x128xf32>,
    return
  }
  func.func @transform_0(%arg0: i32) -> (i32, i32) {
    %c0_i32 = arith.constant 0 : i32
    %c0_i32_0 = arith.constant 0 : i32
    return %arg0, %c0_i32 : i32, i32
  }
  func.func @transform_1(%arg0: i32) -> (i32, i32) {
    %c0_i32 = arith.constant 0 : i32
    %c0_i32_0 = arith.constant 0 : i32
    return %arg0, %c0_i32 : i32, i32
  }
  func.func @transform_2(%arg0: i32) -> (i32, i32) {
    %c0_i32 = arith.constant 0 : i32
    %c0_i32_0 = arith.constant 0 : i32
    return %arg0, %c0_i32 : i32, i32
  }
}

</mosaic_0001>

<bundles_post_ra>
// kernel: tpu_custom_call.1
= control target key start
LH: loop header
LB: loop body
LE: loop exit
PB: predicated region body
PF: predicated region fallthrough
CT: control target
= control target key end

     0   :  { %7 = vsyncpa [#allocation3], 0  ;;  %s759_s0 = inlined_call_operand.hbm [shape: f32[16,128], index: 0, kind: input, shape index: {}]   ;;  %s760_s1 = inlined_call_operand.hbm [shape: f32[16,128], index: 1, kind: input, shape index: {}]   ;;  %s761_s2 = inlined_call_operand.hbm [shape: f32[16,128], index: 2, kind: output, shape index: {}]  }
   0x1   :  { %9 = vsyncpa [#allocation3 + $0x1], 0 }
   0x2   :  { %10 = vsyncpa [#allocation6], 0 }
   0x3   :  { %12 = vsyncpa [#allocation6 + $0x1], 0 }
   0x4   :  { %13 = vsyncpa [#allocation4], 0 }
   0x5   :  { %15 = vsyncpa [#allocation4 + $0x1], 0  ;;  %s554_s9 = smov 0   ;;  %s556_s10 = smov 0  }
   0x6   :  { %s558_s11 = smov 0   ;;  %s560_s12 = smov 0  }
   0x7 LB: > { %s575_s13 = sadd.s32 4294967295, %s534_s12   ;;  %s334_s14 = sadd.s32 4294967294, %s534_s12   ;;  %s534_s12 = sphi %s560_s12, %s780_s12   ;;  %s530_s11 = sphi %s558_s11, %s779_s11   ;;  %s526_s10 = sphi %s556_s10, %s778_s10   ;;  %s522_s9 = sphi %s554_s9, %s777_s9  }
   0x8   : > { %s579_s15 = sadd.s32 1, %s534_s12   ;;  %s28_s16 = sadd.s32 1, %s530_s11 }
   0x9   : > { %s25_s17 = ssub.s32 %s534_s12, %s579_s15  ;;  %p35_p0 = scmp.ne.s32.totalorder %s530_s11, %s526_s10 }
   0xa   : > { %p26_p1 = scmp.eq.s32.totalorder %s25_s17, 0  ;;  %p36_p2 = scmp.eq.s32.totalorder %s534_s12, 0 }
   0xb   : > { %p41_p3 = scmp.ne.s32.totalorder %s526_s10, %s522_s9  ;;  %p42_p4 = scmp.eq.s32.totalorder %s575_s13, 0 }
   0xc   : > { %s591_s18 = scalar_select %p26_p1, %s530_s11, %s28_s16  }
   0xd   : > { %p593_p5 = por %p36_p2, %p35_p0  ;;  %p597_p6 = por %p42_p4, %p41_p3 }
   0xe   : > { %p91_p7 = scmp.eq.s32.totalorder %s575_s13, 1  ;;  %p97_p8 = scmp.eq.s32.totalorder %s334_s14, 1 }
   0xf   : > { %s765_s20 = scalar_select %p597_p6, 1, 0 }
  0x10   : > { %p366_p10 = scmp.lt.s32.totalorder %s534_s12, 2  ;;  %p604_p11 = por %p91_p7, %p35_p0 }
  0x11   : > { %p608_p12 = por %p97_p8, %p41_p3  ;;  %s613_s23 = sand.u32 1, %s530_s11  }
  0x12   : > { %s766_s21 = scalar_select %p604_p11, 1, 0 }
  0x13   : > { %s767_s22 = scalar_select %p608_p12, 1, 0 }
  0x14   : > { %s338_s24 = sshll.u32 %s534_s12, 7  ;;  %s337_s25 = sshll.u32 %s613_s23, 3 }
  0x15   : > { %s622_s28 = scalar_lea.hbm %s759_s0, %s338_s24  ;;  %s121_s29 = scalar_lea.vmem [#allocation2], %s337_s25 }
  0x16   : > { %s128_s30 = sshll.u32 %s121_s29, 4  ;;  %p628_p13 = pnand %p366_p10, %p593_p5  ;;  %s632_s30 = int_to_ptr.vmem [resolvable:$true] %s128_s30 }
  0x17   : > { %s118_s4 = scalar_lea.sflag [#allocation3], %s613_s23  ;;  %s410_s5 = scalar_lea.hbm %s622_s28, 128 }
  0x18   : > { %p411_p2 = scmp.ne.s32.totalorder %s622_s28, %s410_s5  ;;  %p412_p3 = pneg %p628_p13 }
  0x19   : > { %s415_s8 = scalar_lea.hbm %s759_s0, 256  ;;  %p416_p5 = scmp.lt.s32.totalorder %s622_s28, %s759_s0 }
  0x1a   : > { %p413_p4 = pnand %p412_p3, %p411_p2  ;;  %p417_p8 = scmp.lt.s32.totalorder %s415_s8, %s410_s5 }
  0x1c   : > { %p414_p7 = pneg %p413_p4  ;;  %p418_p10 = por %p417_p8, %p416_p5 }
  0x1e   : > { %p419_p9 = pnand %p418_p10, %p414_p7 }
  0x20   : > { %422 = shalt.err (!%p419_p9)
}
  0x21   : > { %s423_s17 = scalar_lea.vmem %s632_s30, 128  ;;  %s536_s19 = smov [#allocation2]  }
  0x22   : > { %p424_p0 = scmp.ne.s32.totalorder %s632_s30, %s423_s17  ;;  %s428_s26 = sshll.u32 %s536_s19, 4  ;;  %s429_s26 = int_to_ptr.vmem [resolvable:$false] %s428_s26 }
  0x23   : > { %s430_s27 = scalar_lea.vmem %s429_s26, 256  ;;  %p431_p1 = scmp.lt.s32.totalorder %s632_s30, %s429_s26 }
  0x24   : > { %p426_p2 = pnand %p424_p0, %p412_p3  ;;  %p432_p12 = scmp.lt.s32.totalorder %s430_s27, %s423_s17 }
  0x26   : > { %p427_p4 = pneg %p426_p2  ;;  %p433_p11 = por %p432_p12, %p431_p1 }
  0x28   : > { %p434_p5 = pnand %p433_p11, %p427_p4 }
  0x2a   : > { %437 = shalt.err (!%p434_p5)
}
  0x2b   : > { %358 = dma.hbm_to_vmem [thread:$0]  (!%p628_p13), %s622_s28, 128, %s632_s30, %s118_s4  }
  0x2c   : > { %p769_p9 = scmp.lt.s32.totalorder %s534_s12, 3  ;;  %p770_p0 = scmp.ge.s32.totalorder %s534_s12, 1 }
  0x2d   : > { %s674_s7 = scalar_lea.hbm %s760_s1, %s338_s24  ;;  %s139_s8 = scalar_lea.vmem [#allocation5], %s337_s25 }
  0x2e   : > { %p665_p7 = pnand %p770_p0, %p769_p9  ;;  %s146_s14 = sshll.u32 %s139_s8, 4  ;;  %s147_s14 = int_to_ptr.vmem [resolvable:$true] %s146_s14 }
  0x2f   : > { %s136_s28 = scalar_lea.sflag [#allocation6], %s613_s23  ;;  %s438_s30 = scalar_lea.hbm %s674_s7, 128 }
  0x30   : > { %s771_s29 = scalar_select %p665_p7, 1, 0 }
  0x31   : > { %p439_p11 = scmp.ne.s32.totalorder %s674_s7, %s438_s30  ;;  %s443_s17 = scalar_lea.hbm %s760_s1, 256 }
  0x32   : > { %p444_p8 = scmp.lt.s32.totalorder %s674_s7, %s760_s1  ;;  %p445_p10 = scmp.lt.s32.totalorder %s443_s17, %s438_s30 }
  0x33   : > { %p441_p12 = pnand %p439_p11, %p412_p3 }
  0x34   : > { %p446_p2 = por %p445_p10, %p444_p8 }
  0x35   : > { %p442_p1 = pneg %p441_p12 }
  0x37   : > { %p447_p4 = pnand %p446_p2, %p442_p1 }
  0x39   : > { %450 = shalt.err (!%p447_p4)
}
  0x3a   : > { %s451_s25 = scalar_lea.vmem %s147_s14, 128  ;;  %s537_s23 = smov [#allocation5]  }
  0x3b   : > { %p452_p5 = scmp.ne.s32.totalorder %s147_s14, %s451_s25  ;;  %s456_s26 = sshll.u32 %s537_s23, 4  ;;  %s457_s26 = int_to_ptr.vmem [resolvable:$false] %s456_s26 }
  0x3c   : > { %s458_s27 = scalar_lea.vmem %s457_s26, 256  ;;  %p459_p11 = scmp.lt.s32.totalorder %s147_s14, %s457_s26 }
  0x3d   : > { %p454_p9 = pnand %p452_p5, %p412_p3  ;;  %p460_p12 = scmp.lt.s32.totalorder %s458_s27, %s451_s25 }
  0x3f   : > { %p455_p0 = pneg %p454_p9  ;;  %p461_p6 = por %p460_p12, %p459_p11 }
  0x41   : > { %p462_p7 = pnand %p461_p6, %p455_p0 }
  0x43   : > { %465 = shalt.err (!%p462_p7)
}
  0x44   : > { %361 = dma.hbm_to_vmem [thread:$0]  (!%p628_p13), %s674_s7, 128, %s147_s14, %s136_s28  }
  0x45   : > { %p772_p1 = scmp.ne.s32.totalorder %s771_s29, 0 }
  0x46   : > { %s700_s5 = sand.u32 (!%p772_p1), 1, %s526_s10   ;;  %p773_p6 = scmp.ne.s32.totalorder (!%p772_p1), %s765_s20, 0 }
  0x47   : > { %155 = sbr.rel (%p772_p1) target bundleno = 416 (0x1a0), region = 28  ;;  %s703_s6 = sshll.u32 (!%p772_p1), %s700_s5, 3 }
  0x48   : > { %s158_s8 = scalar_lea.sflag (!%p772_p1), [#allocation3], %s700_s5  ;;  %s161_s30 = scalar_lea.vmem (!%p772_p1), [#allocation2], %s703_s6 }
  0x4c   : > { %509 = dma.done.wait (%p773_p6), %s158_s8, 128  }
  0x4d   : > { %511 = vsyncadd (%p773_p6), %s158_s8, 4294967168  ;;  %s167_s3 = scalar_lea.sflag [#allocation6], %s700_s5  ;;  %s170_s29 = scalar_lea.vmem [#allocation5], %s703_s6 }
  0x4e   : > { %513 = dma.done.wait (%p773_p6), %s167_s3, 128  }
  0x4f   : > { %515 = vsyncadd (%p773_p6), %s167_s3, 4294967168  ;;  %v196_v0 = vld [vmem:[%s161_s30] sm:$0xff]  ;;  %v198_v1 = vld [vmem:[%s170_s29] sm:$0xff]  ;;  %s346_s20 = sshll.u32 %s575_s13, 7  ;;  %s195_s7 = scalar_lea.vmem [#allocation7], %s703_s6 }
  0x50   : > { %v197_v2 = vmul.f32 0.5, %v196_v0  ;;  %v199_v3 = vmul.f32 0.5, %v198_v1  ;;  %s241_s14 = sshll.u32 %s195_s7, 4  ;;  %s722_s16 = scalar_lea.hbm %s761_s2, %s346_s20  ;;  %s242_s14 = int_to_ptr.vmem [resolvable:$true] %s241_s14 }
  0x51   : > { %s228_s17 = scalar_lea.sflag [#allocation4], %s700_s5  ;;  %s466_s24 = scalar_lea.vmem %s242_s14, 128 }
  0x52   : > { %200 = vmax.xlane.f32.xlu0 %v197_v2  ;;  %p467_p13 = scmp.ne.s32.totalorder %s242_s14, %s466_s24  ;;  %p774_p3 = scmp.ne.s32.totalorder %s766_s21, 0 }
  0x53   : > { %s538_s19 = smov [#allocation7]  }
  0x54   : > { %p468_p7 = pnand %p467_p13, %p774_p3  ;;  %s470_s13 = sshll.u32 %s538_s19, 4  ;;  %s471_s13 = int_to_ptr.vmem [resolvable:$false] %s470_s13 }
  0x55   : > { %s472_s25 = scalar_lea.vmem %s471_s13, 256  ;;  %p473_p10 = scmp.lt.s32.totalorder %s242_s14, %s471_s13 }
  0x56   : > { %210 = vmax.xlane.f32.xlu0 %v199_v3  ;;  %p469_p8 = pneg %p468_p7  ;;  %p474_p2 = scmp.lt.s32.totalorder %s472_s25, %s466_s24 }
  0x58   : > { %p475_p4 = por %p474_p2, %p473_p10 }
  0x5a   : > { %p476_p5 = pnand %p475_p4, %p469_p8 }
  0xdb   : > { %v201_v4 = vpop.xlane.xlu0 %200 }
  0xdc   : > { %v202_v5 = vsub.f32 %v197_v2, %v201_v4 }
  0xde   : > { %v203_v6 = vmul.f32 1.442695, %v202_v5 }
  0xdf   : > { %v211_v7 = vpop.xlane.xlu0 %210 }
  0xe0   : > { %v212_v8 = vsub.f32 %v199_v3, %v211_v7  ;;  %400 = vpow2.f32 %v203_v6 }
  0xe2   : > { %v213_v9 = vmul.f32 1.442695, %v212_v8 }
  0xe4   : > { %402 = vpow2.f32 %v213_v9 }
  0xed   : > { %v401_v10 = vpop.eup %400 }
  0xee   : > { %205 = vadd.xlane.f32.xlu1 %v401_v10 }
  0xf1   : > { %v403_v11 = vpop.eup %402 }
  0xf2   : > { %215 = vadd.xlane.f32.xlu1 %v403_v11 }
 0x177   : > { %v206_v12 = vpop.xlane.xlu1 %205 }
 0x178   : > { %404 = vlog2.f32 %v206_v12 }
 0x17b   : > { %v216_v13 = vpop.xlane.xlu1 %215 }
 0x17c   : > { %406 = vlog2.f32 %v216_v13 }
 0x17d   : > { %408 = vrcp.f32 %v216_v13 }
 0x185   : > { %v405_v14 = vpop.eup %404 }
 0x186   : > { %v208_v15 = vmul.f32 0.6931472, %v405_v14 }
 0x188   : > { %v209_v19 = vsub.f32 %v202_v5, %v208_v15 }
 0x189   : > { %v407_v16 = vpop.eup %406 }
 0x18a   : > { %v409_v17 = vpop.eup %408  ;;  %v218_v18 = vmul.f32 0.6931472, %v407_v16 }
 0x18b   : > { %v221_v21 = vmul.f32 %v409_v17, %v403_v11 }
 0x18c   : > { %v219_v20 = vsub.f32 %v212_v8, %v218_v18 }
 0x18d   : > { %vm222_vm0 = vcmp.gt.f32.partialorder %v221_v21, 0.0 }
 0x18e   : > { %v223_v22 = vsub.f32 %v219_v20, %v209_v19 }
 0x190   : > { %v224_v23 = vmul.f32 %v223_v22, %v221_v21 }
 0x192   : > { %v225_v24 = vsel %vm222_vm0, %v224_v23, 0.0 }
 0x193   : > { %226 = vst [vmem:[%s195_s7] sm:$0xff] %v225_v24 }
 0x194   : > { %479 = shalt.err (!%p476_p5)
}
 0x195   : > { %s480_s23 = scalar_lea.hbm %s722_s16, 128  ;;  %s484_s5 = scalar_lea.hbm %s761_s2, 256 }
 0x196   : > { %p481_p9 = scmp.ne.s32.totalorder %s722_s16, %s480_s23  ;;  %p485_p12 = scmp.lt.s32.totalorder %s722_s16, %s761_s2 }
 0x197   : > { %p486_p1 = scmp.lt.s32.totalorder %s484_s5, %s480_s23 }
 0x198   : > { %p482_p0 = pnand %p481_p9, %p774_p3 }
 0x199   : > { %p487_p6 = por %p486_p1, %p485_p12 }
 0x19a   : > { %p483_p11 = pneg %p482_p0 }
 0x19c   : > { %p488_p13 = pnand %p487_p6, %p483_p11 }
 0x19e   : > { %491 = shalt.err (!%p488_p13)
}
 0x19f   : > { %353 = dma.vmem_to_hbm [thread:$0]  (%p774_p3), %s242_s14, 128, %s722_s16, %s228_s17  }
 0x1a0 PF: > { %s253_s30 = sand.u32 1, %s522_s9   ;;  %p775_p7 = scmp.ne.s32.totalorder %s767_s22, 0 }
 0x1a1   : > { %p776_p8 = scmp.ge.s32.totalorder %s534_s12, 2  ;;  %s254_s3 = scalar_lea.sflag [#allocation4], %s253_s30 }
 0x1a3   : > { %p363_p10 = pnand %p776_p8, %p775_p7 }
 0x1a5   : > { %p364_p2 = pneg %p363_p10 }
 0x1a7   : > { %517 = dma.done.wait (%p364_p2), %s254_s3, 128  }
 0x1a8   : > { %519 = vsyncadd (%p364_p2), %s254_s3, 4294967168  ;;  %p18_p4 = scmp.ge.s32.totalorder %s579_s15, 4   ;;  %s777_s9 = smov %s526_s10 }
 0x1a9   : > { %s778_s10 = smov %s530_s11  ;;  %s779_s11 = smov %s591_s18 }
 0x1aa   : > { %s780_s12 = smov %s579_s15  ;;  %20 = sbr.rel (!%p18_p4) target bundleno = 7 (0x7), region = 86 }
 0x1af   :  { %259 = vsyncpa [#allocation3], 1 }
 0x1b0   :  { %261 = vsyncpa [#allocation3 + $0x1], 1 }
 0x1b1   :  { %262 = vsyncpa [#allocation6], 1 }
 0x1b2   :  { %264 = vsyncpa [#allocation6 + $0x1], 1 }
 0x1b3   :  { %265 = vsyncpa [#allocation4], 1 }
 0x1b4   :  { %267 = vsyncpa [#allocation4 + $0x1], 1 }

</bundles_post_ra>
